<compile_context>
chip_gen: v5e
topology: v5e:2x2
jax: 0.10.0
libtpu: 0.0.40
codegen_flags: <defaults>
</compile_context>

<pallas_src>
import jax
import jax.numpy as jnp
from jax.experimental import pallas as pl
from jax.experimental.pallas import tpu as pltpu


def _round_up(n, m):
    return ((n + m - 1) // m) * m


def lstm_fc_kernel(x_ref, wih_t_ref, bias_ref, wfc_t_ref, bfc_ref, out_ref):
    # Hp = per-gate (lane-aligned) column width; gate order is [i | g | o].
    Hp = wfc_t_ref.shape[0]

    # ---- LSTM cell (single timestep, h0 = c0 = 0, f-gate eliminated) ----
    gates = jnp.dot(
        x_ref[...], wih_t_ref[...], preferred_element_type=jnp.float32
    ) + bias_ref[...]                                   # (TB, 3*Hp)

    i = jax.nn.sigmoid(gates[:, 0 * Hp:1 * Hp])          # input gate
    g = jnp.tanh(gates[:, 1 * Hp:2 * Hp])                # cell candidate
    o = jax.nn.sigmoid(gates[:, 2 * Hp:3 * Hp])          # output gate

    h = o * jnp.tanh(i * g)                              # (TB, Hp)  c = i*g

    # ---- fc head (padded to Op lanes; padded W_fc rows/cols are zero) ----
    out = jnp.dot(
        h, wfc_t_ref[...], preferred_element_type=jnp.float32
    ) + bfc_ref[...]                                     # (TB, Op)
    out_ref[...] = out.astype(out_ref.dtype)


def lstm_classifier_forward(x, w_ih, w_hh, b_ih, b_hh, w_fc, b_fc):
    """x: (B, input_size). Returns (B, output_size)."""
    B, I = x.shape
    four_h = w_ih.shape[0]
    H = four_h // 4
    O = w_fc.shape[0]

    Hp = _round_up(H, 128)      # lane-aligned per-gate block width
    Op = _round_up(O, 128)      # lane-dense output width

    # ---- weight prep (all outside the kernel) ----
    # Keep only i, g, o gates (rows 0, 2, 3 of the PyTorch (4H, I) weight);
    # fold b_ih + b_hh (h0 == 0); pad each gate block to Hp columns.
    bias_full = b_ih + b_hh
    gate_rows = (0, 2, 3)                       # i, g, o in PyTorch gate order
    wih_blocks, bias_blocks = [], []
    for gi in gate_rows:
        wg = w_ih[gi * H:(gi + 1) * H, :].T                      # (I, H)
        wih_blocks.append(jnp.pad(wg, ((0, 0), (0, Hp - H))))
        bg = bias_full[gi * H:(gi + 1) * H]
        bias_blocks.append(jnp.pad(bg, (0, Hp - H)))
    w_ih_t = jnp.concatenate(wih_blocks, axis=1)                 # (I, 3*Hp)
    bias = jnp.concatenate(bias_blocks).reshape(1, 3 * Hp)       # (1, 3*Hp)

    w_fc_t = jnp.pad(w_fc.T, ((0, Hp - H), (0, Op - O)))         # (Hp, Op)
    b_fc2 = jnp.pad(b_fc, (0, Op - O)).reshape(1, Op)            # (1, Op)

    # ---- batch tiling ----
    TB = 256 if B >= 256 else _round_up(B, 8)   # multiple of 8 sublanes
    Bp = _round_up(B, TB)
    x_p = jnp.pad(x, ((0, Bp - B), (0, 0)))

    out_p = pl.pallas_call(
        lstm_fc_kernel,
        out_shape=jax.ShapeDtypeStruct((Bp, Op), x.dtype),
        grid=(Bp // TB,),
        in_specs=[
            pl.BlockSpec((TB, I), lambda i: (i, 0)),         # x tile (pipelined)
            pl.BlockSpec((I, 3 * Hp), lambda i: (0, 0)),     # resident weights
            pl.BlockSpec((1, 3 * Hp), lambda i: (0, 0)),
            pl.BlockSpec((Hp, Op), lambda i: (0, 0)),
            pl.BlockSpec((1, Op), lambda i: (0, 0)),
        ],
        out_specs=pl.BlockSpec((TB, Op), lambda i: (i, 0)),
        compiler_params=pltpu.CompilerParams(
            dimension_semantics=("parallel",),               # megacore on v7x
            vmem_limit_bytes=32 << 20,                       # fits v7x 64 MiB
        ),
    )(x_p, w_ih_t, bias, w_fc_t, b_fc2)

    return out_p[:B, :O]


def reference_forward(x, w_ih, w_hh, b_ih, b_hh, w_fc, b_fc):
    """Pure-JAX reference mirroring the PyTorch forward (seq_len == 1, h0=c0=0)."""
    H = w_hh.shape[1]
    gates = x @ w_ih.T + b_ih + b_hh
    i = jax.nn.sigmoid(gates[:, 0 * H:1 * H])
    g = jnp.tanh(gates[:, 2 * H:3 * H])
    o = jax.nn.sigmoid(gates[:, 3 * H:4 * H])
    h = o * jnp.tanh(i * g)
    return h @ w_fc.T + b_fc


if __name__ == "__main__":
    # Small deterministic shapes consistent with the module.
    B, INPUT, HIDDEN, OUTPUT = 8, 16, 32, 8

    key = jax.random.PRNGKey(0)
    kx, k1, k2, k3, k4, k5, k6 = jax.random.split(key, 7)

    x = jax.random.normal(kx, (B, INPUT), dtype=jnp.float32)

    scale = 0.1
    w_ih = scale * jax.random.normal(k1, (4 * HIDDEN, INPUT), dtype=jnp.float32)
    w_hh = scale * jax.random.normal(k2, (4 * HIDDEN, HIDDEN), dtype=jnp.float32)
    b_ih = scale * jax.random.normal(k3, (4 * HIDDEN,), dtype=jnp.float32)
    b_hh = scale * jax.random.normal(k4, (4 * HIDDEN,), dtype=jnp.float32)
    w_fc = scale * jax.random.normal(k5, (OUTPUT, HIDDEN), dtype=jnp.float32)
    b_fc = scale * jax.random.normal(k6, (OUTPUT,), dtype=jnp.float32)

    out = lstm_classifier_forward(x, w_ih, w_hh, b_ih, b_hh, w_fc, b_fc)
    out = jax.block_until_ready(out)

    ref = reference_forward(x, w_ih, w_hh, b_ih, b_hh, w_fc, b_fc)
    assert out.shape == (B, OUTPUT)
    assert jnp.allclose(out, ref, atol=1e-5, rtol=1e-5), "mismatch vs reference"

    print("KERNEL_OK")
</pallas_src>

<mosaic_0001>
module attributes {stable_mosaic.version = 11 : i64} {
  func.func @lstm_fc_kernel(%arg0: i32, %arg1: memref<8x16xf32, #tpu.memory_space<vmem>>, %arg2: memref<16x384xf32, #tpu.memory_space<vmem>>, %arg3: memref<1x384xf32, #tpu.memory_space<vmem>>, %arg4: memref<128x128xf32, #tpu.memory_space<vmem>>, %arg5: memref<1x128xf32, #tpu.memory_space<vmem>>, %arg6: memref<8x128xf32, #tpu.memory_space<vmem>>) attributes {dimension_semantics = [#tpu.dimension_semantics<parallel>], iteration_bounds = array<i64: 1>, scalar_prefetch = 0 : i64, scratch_operands = 0 : i64, tpu.core_type = #tpu.core_type<tc>, window_params = [{transform_indices = @transform_0, window_bounds = array<i64: 8, 16>}, {pipeline_mode = #tpu.pipeline_mode<synchronous>, transform_indices = @transform_1, window_bounds = array<i64: 16, 384>}, {pipeline_mode = #tpu.pipeline_mode<synchronous>, transform_indices = @transform_2, window_bounds = array<i64: 1, 384>}, {pipeline_mode = #tpu.pipeline_mode<synchronous>, transform_indices = @transform_3, window_bounds = array<i64: 128, 128>}, {pipeline_mode = #tpu.pipeline_mode<synchronous>, transform_indices = @transform_4, window_bounds = array<i64: 1, 128>}, {transform_indices = @transform_5, window_bounds = array<i64: 8, 128>}]} {
    %c0 = arith.constant 0 : index
    %c0_0 = arith.constant 0 : index
    %0 = vector.load %arg1[%c0, %c0_0] : memref<8x16xf32, #tpu.memory_space<vmem>>, vector<8x16xf32>
    %c0_1 = arith.constant 0 : index
    %c0_2 = arith.constant 0 : index
    %1 = vector.load %arg2[%c0_1, %c0_2] : memref<16x384xf32, #tpu.memory_space<vmem>>, vector<16x384xf32>
    %cst = arith.constant dense<0.000000e+00> : vector<8x384xf32>
    %2 = tpu.matmul %0, %1, %cst {dimension_numbers = #tpu.dot_dimension_numbers<[1], [0], [0], [1], [0, 0, 1, 1], [], []>} : vector<8x16xf32>, vector<16x384xf32>, vector<8x384xf32> -> vector<8x384xf32>
    %c0_3 = arith.constant 0 : index
    %c0_4 = arith.constant 0 : index
    %3 = vector.load %arg3[%c0_3, %c0_4] : memref<1x384xf32, #tpu.memory_space<vmem>>, vector<1x384xf32>
    %4 = vector.broadcast %3 : vector<1x384xf32> to vector<8x384xf32>
    %5 = arith.addf %2, %4 : vector<8x384xf32>
    %6 = vector.extract_strided_slice %5 {offsets = [0, 0], sizes = [8, 128], strides = [1, 1]} : vector<8x384xf32> to vector<8x128xf32>
    %7 = arith.negf %6 : vector<8x128xf32>
    %8 = math.exp %7 : vector<8x128xf32>
    %cst_5 = arith.constant 1.000000e+00 : f32
    %9 = vector.broadcast %cst_5 : f32 to vector<8x128xf32>
    %10 = arith.addf %9, %8 : vector<8x128xf32>
    %11 = arith.divf %9, %10 : vector<8x128xf32>
    %12 = vector.extract_strided_slice %5 {offsets = [0, 128], sizes = [8, 128], strides = [1, 1]} : vector<8x384xf32> to vector<8x128xf32>
    %13 = math.tanh %12 : vector<8x128xf32>
    %14 = vector.extract_strided_slice %5 {offsets = [0, 256], sizes = [8, 128], strides = [1, 1]} : vector<8x384xf32> to vector<8x128xf32>
    %15 = arith.negf %14 : vector<8x128xf32>
    %16 = math.exp %15 : vector<8x128xf32>
    %cst_6 = arith.constant 1.000000e+00 : f32
    %17 = vector.broadcast %cst_6 : f32 to vector<8x128xf32>
    %18 = arith.addf %17, %16 : vector<8x128xf32>
    %19 = arith.divf %17, %18 : vector<8x128xf32>
    %20 = arith.mulf %11, %13 : vector<8x128xf32>
    %21 = math.tanh %20 : vector<8x128xf32>
    %22 = arith.mulf %19, %21 : vector<8x128xf32>
    %c0_7 = arith.constant 0 : index
    %c0_8 = arith.constant 0 : index
    %23 = vector.load %arg4[%c0_7, %c0_8] : memref<128x128xf32, #tpu.memory_space<vmem>>, vector<128x128xf32>
    %cst_9 = arith.constant dense<0.000000e+00> : vector<8x128xf32>
    %24 = tpu.matmul %22, %23, %cst_9 {dimension_numbers = #tpu.dot_dimension_numbers<[1], [0], [0], [1], [0, 0, 1, 1], [], []>} : vector<8x128xf32>, vector<128x128xf32>, vector<8x128xf32> -> vector<8x128xf32>
    %c0_10 = arith.constant 0 : index
    %c0_11 = arith.constant 0 : index
    %25 = vector.load %arg5[%c0_10, %c0_11] : memref<1x128xf32, #tpu.memory_space<vmem>>, vector<1x128xf32>
    %26 = vector.broadcast %25 : vector<1x128xf32> to vector<8x128xf32>
    %27 = arith.addf %24, %26 : vector<8x128xf32>
    %c0_12 = arith.constant 0 : index
    %c0_13 = arith.constant 0 : index
    %28 = vector.load %arg6[%c0_12, %c0_13] : memref<8x128xf32, #tpu.memory_space<vmem>>, vector<8x128xf32>
    tpu.vector_store %arg6[%c0_12, %c0_13], %27 {strides = array<i32>} : memref<8x128xf32, #tpu.memory_space<vmem>>, vector<8x128xf32>,
    return
  }
  func.func @transform_0(%arg0: i32) -> (i32, i32) {
    %c0_i32 = arith.constant 0 : i32
    %c0_i32_0 = arith.constant 0 : i32
    return %arg0, %c0_i32 : i32, i32
  }
  func.func @transform_1(%arg0: i32) -> (i32, i32) {
    %c0_i32 = arith.constant 0 : i32
    %c0_i32_0 = arith.constant 0 : i32
    %c0_i32_1 = arith.constant 0 : i32
    return %c0_i32, %c0_i32_0 : i32, i32
  }
  func.func @transform_2(%arg0: i32) -> (i32, i32) {
    %c0_i32 = arith.constant 0 : i32
    %c0_i32_0 = arith.constant 0 : i32
    %c0_i32_1 = arith.constant 0 : i32
    return %c0_i32, %c0_i32_0 : i32, i32
  }
  func.func @transform_3(%arg0: i32) -> (i32, i32) {
    %c0_i32 = arith.constant 0 : i32
    %c0_i32_0 = arith.constant 0 : i32
    %c0_i32_1 = arith.constant 0 : i32
    return %c0_i32, %c0_i32_0 : i32, i32
  }
  func.func @transform_4(%arg0: i32) -> (i32, i32) {
    %c0_i32 = arith.constant 0 : i32
    %c0_i32_0 = arith.constant 0 : i32
    %c0_i32_1 = arith.constant 0 : i32
    return %c0_i32, %c0_i32_0 : i32, i32
  }
  func.func @transform_5(%arg0: i32) -> (i32, i32) {
    %c0_i32 = arith.constant 0 : i32
    %c0_i32_0 = arith.constant 0 : i32
    return %arg0, %c0_i32 : i32, i32
  }
}

</mosaic_0001>

<bundles_post_ra>
// kernel: tpu_custom_call.1
= control target key start
LH: loop header
LB: loop body
LE: loop exit
PB: predicated region body
PF: predicated region fallthrough
CT: control target
= control target key end

     0   :  { %10 = vsyncpa [#allocation3], 0  ;;  %s473_s0 = inlined_call_operand.hbm [shape: f32[8,16], index: 0, kind: input, shape index: {}]   ;;  %s474_s1 = inlined_call_operand.hbm [shape: f32[16,384], index: 1, kind: input, shape index: {}]   ;;  %s475_s2 = inlined_call_operand.hbm [shape: f32[1,384], index: 2, kind: input, shape index: {}]   ;;  %s476_s3 = inlined_call_operand.hbm [shape: f32[128,128], index: 3, kind: input, shape index: {}]   ;;  %s477_s4 = inlined_call_operand.vmem [shape: f32[1,128], index: 4, kind: input, shape index: {}]   ;;  %s478_s5 = inlined_call_operand.hbm [shape: f32[8,128], index: 5, kind: output, shape index: {}]  }
   0x1   :  { %11 = vsyncpa [#allocation6], 0 }
   0x2   :  { %12 = vsyncpa [#allocation9], 0  ;;  %s29_s20 = sshll.u32 %s474_s1, 4  ;;  %s30_s20 = int_to_ptr.hbm [resolvable:$true] %s29_s20 }
   0x3   :  { %13 = vsyncpa [#allocation4], 0  ;;  %s416_s21 = smov [#allocation5]   ;;  %s19_s25 = sshll.u32 %s473_s0, 4  ;;  %s20_s25 = int_to_ptr.hbm [resolvable:$true] %s19_s25 }
   0x4   :  { %s31_s22 = sshll.u32 %s416_s21, 4  ;;  %s417_s26 = smov 384   ;;  %s32_s22 = int_to_ptr.vmem [resolvable:$true] %s31_s22 }
   0x5   :  { %s418_s27 = smov 24   ;;  %s419_s28 = smov [#allocation2]  }
   0x6   :  { %37 = dma.hbm_to_vmem [thread:$0]  %s30_s20, 768, %s32_s22, [#allocation6], %s417_s26, %s417_s26, %s418_s27  }
   0x7   :  { %s21_s29 = sshll.u32 %s419_s28, 4  ;;  %s43_s7 = sshll.u32 %s475_s2, 4  ;;  %s22_s29 = int_to_ptr.vmem [resolvable:$true] %s21_s29  ;;  %s44_s7 = int_to_ptr.hbm [resolvable:$true] %s43_s7 }
   0x8   :  { %24 = dma.hbm_to_vmem [thread:$0]  %s20_s25, 128, %s22_s29, [#allocation3]  }
   0x9   :  { %s53_s9 = sshll.u32 %s476_s3, 4  ;;  %s420_s10 = smov [#allocation7]   ;;  %s54_s9 = int_to_ptr.hbm [resolvable:$true] %s53_s9 }
   0xa   :  { %s45_s11 = sshll.u32 %s420_s10, 4  ;;  %s421_s0 = smov [#allocation8]   ;;  %s46_s11 = int_to_ptr.vmem [resolvable:$true] %s45_s11 }
   0xb   :  { %48 = dma.hbm_to_vmem [thread:$0]  %s44_s7, 48, %s46_s11, [#allocation6]  }
   0xc   :  { %s55_s12 = sshll.u32 %s421_s0, 4  ;;  %s422_s13 = smov 128   ;;  %s56_s12 = int_to_ptr.vmem [resolvable:$true] %s55_s12 }
   0xd   :  { %s423_s14 = smov 8  }
   0xe   :  { %61 = dma.hbm_to_vmem [thread:$0]  %s54_s9, 2048, %s56_s12, [#allocation9], %s422_s13, %s422_s13, %s423_s14  }
   0xf   :  { %408 = dma.done.wait [#allocation3], 128  }
  0x10   :  { %409 = vsyncadd [#allocation3], 4294967168 }
  0x11   :  { %410 = dma.done.wait [#allocation6], 816  }
  0x12   :  { %411 = vsyncadd [#allocation6], 4294966480 }
  0x13   :  { %412 = dma.done.wait [#allocation9], 2048  }
  0x14   :  { %413 = vsyncadd [#allocation9], 4294965248  ;;  %v84_v0 = vld [vmem:[#allocation5 + $0x18] sm:$0xff]  ;;  %v86_v1 = vld [vmem:[#allocation5 + $0x28] sm:$0xff]  ;;  %vm95_vm0 = vcmask 130048   ;;  %s424_s15 = smov [#allocation10]  }
  0x15   :  { %v81_v2 = vld [vmem:[#allocation5] sm:$0xff]  ;;  %113 = vmatpush.msra.mxu0 %v84_v0  ;;  %153 = vmatpush.msra.mxu2 %v86_v1  ;;  %v83_v3 = vld [vmem:[#allocation5 + $0x10] sm:$0xff]  ;;  %v80_v4 = vld [vmem:[#allocation2] sm:$0xff]  ;;  %s247_s16 = sshll.u32 %s424_s15, 4  ;;  %s249_s19 = sshll.u32 %s478_s5, 4  ;;  %s248_s16 = int_to_ptr.vmem [resolvable:$true] %s247_s16  ;;  %s250_s19 = int_to_ptr.hbm [resolvable:$true] %s249_s19 }
  0x16   :  { %v85_v5 = vld [vmem:[#allocation5 + $0x20] sm:$0xff]  ;;  %v82_v6 = vld [vmem:[#allocation5 + $0x8] sm:$0xff]  ;;  %v213_v10 = vld [vmem:[#allocation8 + $0x60] sm:$0xff] }
  0x17   :  { %133 = vmatpush.msra.mxu1 %v85_v5  ;;  %114 = vmatpush.msra.mxu0 %v81_v2  ;;  %v216_v7 = vld [vmem:[#allocation8 + $0x78] sm:$0xff]  ;;  %v215_v8 = vld [vmem:[#allocation8 + $0x70] sm:$0xff]  ;;  %v214_v9 = vld [vmem:[#allocation8 + $0x68] sm:$0xff] }
  0x18   :  { %154 = vmatpush.msra.mxu2 %v83_v3  ;;  %261 = vmatmul.msk.f32.vlgmr.msra.gmra.mxu0 %vm95_vm0, %v80_v4  ;;  %v212_v11 = vld [vmem:[#allocation8 + $0x58] sm:$0xff]  ;;  %v211_v12 = vld [vmem:[#allocation8 + $0x50] sm:$0xff]  ;;  %v210_v13 = vld [vmem:[#allocation8 + $0x48] sm:$0xff] }
  0x19   :  { %263 = vmatmul.msk.f32.vlgmr.msra.gmra.mxu2 %vm95_vm0, %v80_v4  ;;  %134 = vmatpush.msra.mxu1 %v82_v6  ;;  %v209_v14 = vld [vmem:[#allocation8 + $0x40] sm:$0xff]  ;;  %v87_v15 = vld [vmem:[#allocation7] sm:$0x7]  ;;  %v207_v17 = vld [vmem:[#allocation8 + $0x30] sm:$0xff] }
  0x1a   :  { %262 = vmatmul.msk.f32.vlgmr.msra.gmra.mxu1 %vm95_vm0, %v80_v4  ;;  %221 = vmatpush.msra.mxu3 %v216_v7  ;;  %v208_v16 = vld [vmem:[#allocation8 + $0x38] sm:$0xff]  ;;  %v89_v18 = vperm.slane %v87_v15, 0  ;;  %v206_v19 = vld [vmem:[#allocation8 + $0x28] sm:$0xff]  ;;  %v205_v20 = vld [vmem:[#allocation8 + $0x20] sm:$0xff]  ;;  %v91_v26 = vperm.slane %v87_v15, 2  ;;  %v90_v34 = vperm.slane %v87_v15, 1 }
  0x1b   :  { %v204_v22 = vld [vmem:[#allocation8 + $0x18] sm:$0xff]  ;;  %v203_v24 = vld [vmem:[#allocation8 + $0x10] sm:$0xff]  ;;  %v202_v27 = vld [vmem:[#allocation8 + $0x8] sm:$0xff] }
  0x1c   :  { %222 = vmatpush.msra.mxu3 %v215_v8  ;;  %v201_v29 = vld [vmem:[#allocation8] sm:$0xff] }
  0x1d   :  { %v275_v63 = vld [vmem:[%s477_s4] ss:$0 sm:$0xff] }
  0x1e   :  { %223 = vmatpush.msra.mxu3 %v214_v9 }
  0x20   :  { %224 = vmatpush.msra.mxu3 %v213_v10 }
  0x22   :  { %225 = vmatpush.msra.mxu3 %v212_v11 }
  0x24   :  { %226 = vmatpush.msra.mxu3 %v211_v12 }
  0x26   :  { %227 = vmatpush.msra.mxu3 %v210_v13 }
  0x28   :  { %228 = vmatpush.msra.mxu3 %v209_v14 }
  0x2a   :  { %229 = vmatpush.msra.mxu3 %v208_v16 }
  0x2c   :  { %230 = vmatpush.msra.mxu3 %v207_v17 }
  0x2e   :  { %231 = vmatpush.msra.mxu3 %v206_v19 }
  0x30   :  { %232 = vmatpush.msra.mxu3 %v205_v20 }
  0x32   :  { %233 = vmatpush.msra.mxu3 %v204_v22 }
  0x34   :  { %234 = vmatpush.msra.mxu3 %v203_v24 }
  0x36   :  { %235 = vmatpush.msra.mxu3 %v202_v27 }
  0x38   :  { %236 = vmatpush.msra.mxu3 %v201_v29 }
  0x95   :  { %v116_v21 = vpop.f32.mrf.mxu0 }
  0x96   :  { %v117_v23 = vadd.f32 %v116_v21, %v89_v18 }
  0x97   :  { %v136_v35 = vpop.f32.mrf.mxu1 }
  0x98   :  { %v264_v25 = vmul.f32 -1.442695, %v117_v23  ;;  %v137_v38 = vadd.f32 %v136_v35, %v90_v34 }
  0x9a   :  { %276 = vpow2.f32 %v264_v25 }
  0x9c   :  { %v156_v28 = vpop.f32.mrf.mxu2 }
  0x9d   :  { %v157_v30 = vadd.f32 %v156_v28, %v91_v26 }
  0x9f   :  { %v265_v31 = vmul.f32 -1.442695, %v157_v30 }
  0xa0   :  { %v277_v32 = vpop.eup %276 }
  0xa1   :  { %278 = vpow2.f32 %v265_v31  ;;  %v162_v33 = vadd.f32 1.0, %v277_v32 }
  0xa3   :  { %280 = vrcp.f32 %v162_v33  ;;  %v174_v42 = vand.u32 2147483648, %v162_v33  ;;  %v172_v44 = vand.u32 2147483647, %v162_v33  ;;  %vm168_vm2 = vweird.f32 %v162_v33 }
  0xa5   :  { %v175_v49 = vor.u32 1.1754944e-38, %v174_v42  ;;  %vm173_vm4 = vcmp.eq.f32.partialorder %v172_v44, 8.507059e+37 }
  0xa7   :  { %v279_v36 = vpop.eup %278 }
  0xa8   :  { %v182_v37 = vadd.f32 1.0, %v279_v36 }
  0xa9   :  { %v281_v39 = vpop.eup %280 }
  0xaa   :  { %282 = vrcp.f32 %v182_v37  ;;  %v164_v40 = vmul.f32 %v281_v39, %v162_v33  ;;  %vm169_vm1 = vweird.f32 %v281_v39  ;;  %v194_v56 = vand.u32 2147483648, %v182_v37 }
  0xab   :  { %284 = vtanh.f32 %v137_v38  ;;  %vm170_vm3 = vmor %vm168_vm2, %vm169_vm1  ;;  %vm188_vm6 = vweird.f32 %v182_v37  ;;  %v192_v57 = vand.u32 2147483647, %v182_v37 }
  0xac   :  { %v165_v41 = vsub.f32 1.0, %v164_v40  ;;  %v195_v59 = vor.u32 1.1754944e-38, %v194_v56 }
  0xad   :  { %vm193_vm8 = vcmp.eq.f32.partialorder %v192_v57, 8.507059e+37 }
  0xae   :  { %v166_v43 = vmul.f32 %v281_v39, %v165_v41 }
  0xb0   :  { %v283_v45 = vpop.eup %282  ;;  %v167_v46 = vadd.f32 %v281_v39, %v166_v43 }
  0xb1   :  { %v184_v47 = vmul.f32 %v283_v45, %v182_v37  ;;  %v285_v48 = vpop.eup %284  ;;  %vm189_vm5 = vweird.f32 %v283_v45 }
  0xb2   :  { %v171_v50 = vsel %vm170_vm3, %v281_v39, %v167_v46  ;;  %vm190_vm7 = vmor %vm188_vm6, %vm189_vm5 }
  0xb3   :  { %v185_v51 = vsub.f32 1.0, %v184_v47  ;;  %v176_v52 = vsel %vm173_vm4, %v175_v49, %v171_v50 }
  0xb4   :  { %v198_v53 = vmul.f32 %v285_v48, %v176_v52 }
  0xb5   :  { %v186_v54 = vmul.f32 %v283_v45, %v185_v51 }
  0xb6   :  { %286 = vtanh.f32 %v198_v53 }
  0xb7   :  { %v187_v55 = vadd.f32 %v283_v45, %v186_v54 }
  0xb9   :  { %v191_v58 = vsel %vm190_vm7, %v283_v45, %v187_v55 }
  0xba   :  { %v196_v61 = vsel %vm193_vm8, %v195_v59, %v191_v58 }
  0xbc   :  { %v287_v60 = vpop.eup %286 }
  0xbd   :  { %v200_v62 = vmul.f32 %v287_v60, %v196_v61 }
  0xbf   :  { %237 = vmatmul.f32.vlgmr.msra.gmra.mxu3 %v200_v62 }
 0x142   :  { %v238_v0 = vpop.f32.mrf.mxu3 }
 0x143   :  { %v239_v1 = vadd.f32 %v275_v63, %v238_v0 }
 0x145   :  { %241 = vst [vmem:[#allocation10] sm:$0xff] %v239_v1 }
 0x146   :  { %252 = dma.vmem_to_hbm [thread:$0]  %s248_s16, 128, %s250_s19, [#allocation4]  }
 0x147   :  { %414 = dma.done.wait [#allocation4], 128  }
 0x148   :  { %415 = vsyncadd [#allocation4], 4294967168 }
 0x149   :  { %257 = vsyncpa [#allocation3], 1 }
 0x14a   :  { %258 = vsyncpa [#allocation6], 1 }
 0x14b   :  { %259 = vsyncpa [#allocation9], 1 }
 0x14c   :  { %260 = vsyncpa [#allocation4], 1 }

</bundles_post_ra>
